<compile_context>
chip_gen: v6e
topology: v6e:2x2x1
jax: 0.10.0
libtpu: 0.0.40
codegen_flags: <defaults>
</compile_context>

<pallas_src>
import functools

import jax
import jax.numpy as jnp
from jax import lax
from jax.experimental import pallas as pl
from jax.experimental.pallas import tpu as pltpu


def _round_up(x, m):
    return ((x + m - 1) // m) * m


def _attn_pool_cls_kernel(h_ref, bias_ref, w1_ref, b1_ref, w2_ref, wo_ref,
                          bo_ref, out_ref, m_scr, l_scr, acc_scr, *, tb):
    # h_ref:    (TB, Sc, H)  hidden chunk, native dtype (bf16 or f32)
    # bias_ref: (1, TB, Sc)  f32, = b2 + (1 - mask) * -1e9  (lane-dense over seq)
    # w1_ref:   (H, A) same dtype as hidden ; b1_ref: (1, A) f32
    # w2_ref:   (1, A) f32 (second scorer linear as a lane-dense row)
    # wo_ref:   (H, C) f32 ; bo_ref: (1, C) f32
    # out_ref:  (1, TB, C) f32
    # scratch:  m_scr (TB,1), l_scr (TB,1), acc_scr (TB,H) -- online-softmax state
    k = pl.program_id(1)
    last = pl.num_programs(1) - 1

    @pl.when(k == 0)
    def _init():
        m_scr[...] = jnp.full_like(m_scr, -jnp.inf)
        l_scr[...] = jnp.zeros_like(l_scr)
        acc_scr[...] = jnp.zeros_like(acc_scr)

    w1 = w1_ref[...]
    b1 = b1_ref[...]
    w2 = w2_ref[...]                                    # (1, A)
    bias_blk = bias_ref[0]                              # (TB, Sc) f32

    for b in range(tb):                                 # static, tb is small
        h_b = h_ref[b]                                  # (Sc, H) native dtype
        # scorer first linear + tanh: one MXU matmul
        s1 = jnp.tanh(
            jnp.dot(h_b, w1, preferred_element_type=jnp.float32) + b1)  # (Sc, A)
        # scorer second linear (A -> 1) as a lane-dense (1,A) x (Sc,A)^T matmul
        sc = lax.dot_general(
            w2, s1, dimension_numbers=(((1,), (1,)), ((), ())),
            preferred_element_type=jnp.float32)         # (1, Sc)
        sc = sc + bias_blk[b:b + 1, :]                  # + b2 + (1-mask)*-1e9

        # online softmax update (flash-style), lane-dense throughout
        m_old = m_scr[pl.ds(b, 1), :]                   # (1, 1)
        m_new = jnp.maximum(m_old, jnp.max(sc, axis=1, keepdims=True))
        alpha = jnp.exp(m_old - m_new)                  # (1, 1)
        p = jnp.exp(sc - m_new)                         # (1, Sc)
        l_scr[pl.ds(b, 1), :] = (alpha * l_scr[pl.ds(b, 1), :]
                                 + jnp.sum(p, axis=1, keepdims=True))
        # weighted pooling on the MXU: (1, Sc) @ (Sc, H); no f32 copy of h
        pooled_upd = jnp.dot(p.astype(h_b.dtype), h_b,
                             preferred_element_type=jnp.float32)        # (1, H)
        acc_scr[pl.ds(b, 1), :] = alpha * acc_scr[pl.ds(b, 1), :] + pooled_upd
        m_scr[pl.ds(b, 1), :] = m_new

    @pl.when(k == last)
    def _finalize():
        pooled = acc_scr[...] / l_scr[...]              # (TB, H) f32
        out_ref[0] = (jnp.dot(pooled, wo_ref[...],
                              preferred_element_type=jnp.float32)
                      + bo_ref[...])                    # (TB, C)


def llm_classification_head(hidden, attention_mask, params, *, max_tb=8):
    """hidden: (B, S, H) f32/bf16; attention_mask: (B, S) {0,1}; returns (B, C) f32."""
    B, S, H = hidden.shape
    w1, b1, w2, b2, wo, bo = (params["w1"], params["b1"], params["w2"],
                              params["b2"], params["wo"], params["bo"])
    A = w1.shape[-1]
    C = wo.shape[-1]

    h_dtype = hidden.dtype
    itemsize = jnp.dtype(h_dtype).itemsize

    # ---- VMEM-budget-derived tile sizes (v7x: 64 MiB/TC, v5e/v6e: 128 MiB) ----
    try:
        info = pltpu.get_tpu_info()
        vmem_cap = int(getattr(info, "vmem_capacity_bytes", 64 * 1024 * 1024))
    except Exception:
        vmem_cap = 64 * 1024 * 1024
    budget = int(vmem_cap * 0.6)
    vmem_limit = int(vmem_cap * 0.75)

    def step_bytes(tb, sc):
        hid = 2 * tb * sc * H * itemsize      # double-buffered hidden block
        bias = 2 * tb * sc * 4                # double-buffered bias block
        s1 = 2 * sc * A * 4                   # scorer intermediate (transient)
        wts = H * A * itemsize + H * C * 4 + 4 * (2 * A + 2 * C)
        scr = tb * (H + 2) * 4 + 2 * tb * C * 4
        return hid + bias + s1 + wts + scr

    # batch tile: keep >= 2 grid steps over batch (2-TC sharding + pipelining)
    tb0 = max(1, min(max_tb, B // 2)) if B > 1 else 1
    S16 = _round_up(S, 16)
    sc_options = ([S16] if S16 <= 1024 else []) + [c for c in (1024, 512, 256, 128)
                                                   if c < S16]
    TB = None
    Sc = None
    tb = tb0
    while tb >= 1 and TB is None:
        for sc in sc_options:
            if step_bytes(tb, sc) <= budget:
                TB, Sc = tb, sc
                break
        tb //= 2
    if TB is None:                 # extreme shapes: smallest tiles, best effort
        TB, Sc = 1, sc_options[-1]

    S_pad = _round_up(S, Sc)
    B_pad = _round_up(B, TB)
    n_bt = B_pad // TB
    n_chunks = S_pad // Sc

    # ---- host-side prep (cheap: no dtype pass over hidden; pads are no-ops
    # when S, B are already aligned) ----
    mask = attention_mask.astype(jnp.float32)
    if S_pad != S or B_pad != B:
        # TODO(synk): for production, replace this pad with in-kernel tail
        # masking so there is no extra host-side pass over the activations.
        hidden = jnp.pad(hidden, ((0, B_pad - B), (0, S_pad - S), (0, 0)))

    b2_s = b2.reshape(()).astype(jnp.float32)
    bias = b2_s + (1.0 - mask) * jnp.float32(-1e9)                 # (B, S)
    bias = jnp.pad(bias, ((0, B_pad - B), (0, S_pad - S)),
                   constant_values=-1e9)                           # (B_pad, S_pad)
    bias3 = bias.reshape(n_bt, TB, S_pad)                          # lane-dense blocks

    w1_k = w1.astype(h_dtype)                      # match hidden dtype for the MXU
    b1_2d = b1.reshape(1, A).astype(jnp.float32)
    w2_row = w2.reshape(1, A).astype(jnp.float32)  # (A,1) -> lane-dense row
    wo_2d = wo.astype(jnp.float32)
    bo_2d = bo.reshape(1, C).astype(jnp.float32)

    kernel = functools.partial(_attn_pool_cls_kernel, tb=TB)

    out3 = pl.pallas_call(
        kernel,
        out_shape=jax.ShapeDtypeStruct((n_bt, TB, C), jnp.float32),
        grid_spec=pltpu.PrefetchScalarGridSpec(
            num_scalar_prefetch=0,
            grid=(n_bt, n_chunks),
            in_specs=[
                pl.BlockSpec((TB, Sc, H), lambda i, k: (i, k, 0)),   # hidden chunk
                pl.BlockSpec((1, TB, Sc), lambda i, k: (i, 0, k)),   # mask+b2 bias
                pl.BlockSpec((H, A), lambda i, k: (0, 0)),           # scorer W1
                pl.BlockSpec((1, A), lambda i, k: (0, 0)),           # scorer b1
                pl.BlockSpec((1, A), lambda i, k: (0, 0)),           # scorer W2 row
                pl.BlockSpec((H, C), lambda i, k: (0, 0)),           # output W
                pl.BlockSpec((1, C), lambda i, k: (0, 0)),           # output b
            ],
            out_specs=pl.BlockSpec((1, TB, C), lambda i, k: (i, 0, 0)),
            scratch_shapes=[
                pltpu.VMEM((TB, 1), jnp.float32),   # running max  m
                pltpu.VMEM((TB, 1), jnp.float32),   # running sum  l
                pltpu.VMEM((TB, H), jnp.float32),   # running weighted-sum acc
            ],
        ),
        compiler_params=pltpu.CompilerParams(
            dimension_semantics=("parallel", "arbitrary"),
            vmem_limit_bytes=vmem_limit,
        ),
    )(hidden, bias3, w1_k, b1_2d, w2_row, wo_2d, bo_2d)

    return out3.reshape(B_pad, C)[:B]


def _reference(hidden, attention_mask, params):
    # pure-JAX reference mirroring the PyTorch attention-pooling forward (f32).
    w1, b1, w2, b2, wo, bo = (params["w1"], params["b1"], params["w2"],
                              params["b2"], params["wo"], params["bo"])
    h = hidden.astype(jnp.float32)
    s1 = jnp.tanh(h @ w1 + b1)                           # (B, S, A)
    scores = (s1 @ w2 + b2)[..., 0]                      # (B, S)
    scores = scores + (1.0 - attention_mask.astype(jnp.float32)) * -1e9
    weights = jax.nn.softmax(scores, axis=1)             # (B, S)
    pooled = jnp.sum(h * weights[..., None], axis=1)     # (B, H)
    return pooled @ wo + bo                              # (B, C)


if __name__ == "__main__":
    # small, self-consistent shapes
    B, S, H, A, C = 2, 8, 32, 64, 4

    key = jax.random.PRNGKey(0)
    k_h, k_w1, k_b1, k_w2, k_b2, k_wo, k_bo = jax.random.split(key, 7)

    hidden = jax.random.normal(k_h, (B, S, H), dtype=jnp.float32)
    # deterministic 0/1 attention mask (row 0 has padding, row 1 full)
    seq_lens = jnp.array([5, 8], dtype=jnp.int32)
    attention_mask = (jnp.arange(S)[None, :] < seq_lens[:, None]).astype(jnp.float32)

    params = {
        "w1": jax.random.normal(k_w1, (H, A), dtype=jnp.float32) * 0.05,
        "b1": jax.random.normal(k_b1, (A,), dtype=jnp.float32) * 0.05,
        "w2": jax.random.normal(k_w2, (A, 1), dtype=jnp.float32) * 0.05,
        "b2": jax.random.normal(k_b2, (1,), dtype=jnp.float32) * 0.05,
        "wo": jax.random.normal(k_wo, (H, C), dtype=jnp.float32) * 0.05,
        "bo": jax.random.normal(k_bo, (C,), dtype=jnp.float32) * 0.05,
    }

    logits = llm_classification_head(hidden, attention_mask, params)
    logits = jax.block_until_ready(logits)

    ref = _reference(hidden, attention_mask, params)
    assert logits.shape == (B, C)
    assert jnp.allclose(logits, ref, atol=1e-3, rtol=1e-3), "mismatch vs reference"

    print("KERNEL_OK")
</pallas_src>

<mosaic_0001>
module attributes {stable_mosaic.version = 11 : i64} {
  func.func @_attn_pool_cls_kernel(%arg0: i32, %arg1: i32, %arg2: memref<1x16x32xf32, #tpu.memory_space<vmem>>, %arg3: memref<1x1x16xf32, #tpu.memory_space<vmem>>, %arg4: memref<32x64xf32, #tpu.memory_space<vmem>>, %arg5: memref<1x64xf32, #tpu.memory_space<vmem>>, %arg6: memref<1x64xf32, #tpu.memory_space<vmem>>, %arg7: memref<32x4xf32, #tpu.memory_space<vmem>>, %arg8: memref<1x4xf32, #tpu.memory_space<vmem>>, %arg9: memref<1x1x4xf32, #tpu.memory_space<vmem>>, %arg10: memref<1x1xf32, #tpu.memory_space<vmem>>, %arg11: memref<1x1xf32, #tpu.memory_space<vmem>>, %arg12: memref<1x32xf32, #tpu.memory_space<vmem>>) attributes {dimension_semantics = [#tpu.dimension_semantics<parallel>, #tpu.dimension_semantics<arbitrary>], iteration_bounds = array<i64: 2, 1>, scalar_prefetch = 0 : i64, scratch_operands = 3 : i64, tpu.core_type = #tpu.core_type<tc>, window_params = [{transform_indices = @transform_0, window_bounds = array<i64: 1, 16, 32>}, {transform_indices = @transform_1, window_bounds = array<i64: 1, 1, 16>}, {pipeline_mode = #tpu.pipeline_mode<synchronous>, transform_indices = @transform_2, window_bounds = array<i64: 32, 64>}, {pipeline_mode = #tpu.pipeline_mode<synchronous>, transform_indices = @transform_3, window_bounds = array<i64: 1, 64>}, {pipeline_mode = #tpu.pipeline_mode<synchronous>, transform_indices = @transform_4, window_bounds = array<i64: 1, 64>}, {pipeline_mode = #tpu.pipeline_mode<synchronous>, transform_indices = @transform_5, window_bounds = array<i64: 32, 4>}, {pipeline_mode = #tpu.pipeline_mode<synchronous>, transform_indices = @transform_6, window_bounds = array<i64: 1, 4>}, {transform_indices = @transform_7, window_bounds = array<i64: 1, 1, 4>}]} {
    %c0_i32 = arith.constant 0 : i32
    %0 = arith.cmpi eq, %arg1, %c0_i32 : i32
    %1 = arith.extui %0 : i1 to i32
    %c0_i32_0 = arith.constant 0 : i32
    %2 = arith.cmpi ne, %1, %c0_i32_0 : i32
    scf.if %2 {
      %cst_30 = arith.constant 0xFF800000 : f32
      %41 = vector.broadcast %cst_30 : f32 to vector<1x1xf32>
      %c0_31 = arith.constant 0 : index
      %c0_32 = arith.constant 0 : index
      %42 = vector.load %arg10[%c0_31, %c0_32] : memref<1x1xf32, #tpu.memory_space<vmem>>, vector<1x1xf32>
      tpu.vector_store %arg10[%c0_31, %c0_32], %41 {strides = array<i32>} : memref<1x1xf32, #tpu.memory_space<vmem>>, vector<1x1xf32>,
      %cst_33 = arith.constant 0.000000e+00 : f32
      %43 = vector.broadcast %cst_33 : f32 to vector<1x1xf32>
      %c0_34 = arith.constant 0 : index
      %c0_35 = arith.constant 0 : index
      %44 = vector.load %arg11[%c0_34, %c0_35] : memref<1x1xf32, #tpu.memory_space<vmem>>, vector<1x1xf32>
      tpu.vector_store %arg11[%c0_34, %c0_35], %43 {strides = array<i32>} : memref<1x1xf32, #tpu.memory_space<vmem>>, vector<1x1xf32>,
      %cst_36 = arith.constant 0.000000e+00 : f32
      %45 = vector.broadcast %cst_36 : f32 to vector<1x32xf32>
      %c0_37 = arith.constant 0 : index
      %c0_38 = arith.constant 0 : index
      %46 = vector.load %arg12[%c0_37, %c0_38] : memref<1x32xf32, #tpu.memory_space<vmem>>, vector<1x32xf32>
      tpu.vector_store %arg12[%c0_37, %c0_38], %45 {strides = array<i32>} : memref<1x32xf32, #tpu.memory_space<vmem>>, vector<1x32xf32>,
    } else {
    }
    %c0 = arith.constant 0 : index
    %c0_1 = arith.constant 0 : index
    %3 = vector.load %arg4[%c0, %c0_1] : memref<32x64xf32, #tpu.memory_space<vmem>>, vector<32x64xf32>
    %c0_2 = arith.constant 0 : index
    %c0_3 = arith.constant 0 : index
    %4 = vector.load %arg5[%c0_2, %c0_3] : memref<1x64xf32, #tpu.memory_space<vmem>>, vector<1x64xf32>
    %c0_4 = arith.constant 0 : index
    %c0_5 = arith.constant 0 : index
    %5 = vector.load %arg6[%c0_4, %c0_5] : memref<1x64xf32, #tpu.memory_space<vmem>>, vector<1x64xf32>
    %c0_6 = arith.constant 0 : index
    %c0_7 = arith.constant 0 : index
    %c0_8 = arith.constant 0 : index
    %6 = vector.load %arg3[%c0_6, %c0_7, %c0_8] : memref<1x1x16xf32, #tpu.memory_space<vmem>>, vector<1x1x16xf32>
    %7 = vector.shape_cast %6 : vector<1x1x16xf32> to vector<1x16xf32>
    %c0_9 = arith.constant 0 : index
    %c0_10 = arith.constant 0 : index
    %c0_11 = arith.constant 0 : index
    %8 = vector.load %arg2[%c0_9, %c0_10, %c0_11] : memref<1x16x32xf32, #tpu.memory_space<vmem>>, vector<1x16x32xf32>
    %9 = vector.shape_cast %8 : vector<1x16x32xf32> to vector<16x32xf32>
    %cst = arith.constant dense<0.000000e+00> : vector<16x64xf32>
    %10 = tpu.matmul %9, %3, %cst {dimension_numbers = #tpu.dot_dimension_numbers<[1], [0], [0], [1], [0, 0, 1, 1], [], []>} : vector<16x32xf32>, vector<32x64xf32>, vector<16x64xf32> -> vector<16x64xf32>
    %11 = vector.broadcast %4 : vector<1x64xf32> to vector<16x64xf32>
    %12 = arith.addf %10, %11 : vector<16x64xf32>
    %13 = math.tanh %12 : vector<16x64xf32>
    %cst_12 = arith.constant dense<0.000000e+00> : vector<1x16xf32>
    %14 = tpu.matmul %5, %13, %cst_12 {dimension_numbers = #tpu.dot_dimension_numbers<[1], [1], [0], [0], [0, 0, 1, 0], [], []>} : vector<1x64xf32>, vector<16x64xf32>, vector<1x16xf32> -> vector<1x16xf32>
    %15 = arith.addf %14, %7 : vector<1x16xf32>
    %c0_13 = arith.constant 0 : index
    %c0_14 = arith.constant 0 : index
    %16 = vector.load %arg10[%c0_13, %c0_14] : memref<1x1xf32, #tpu.memory_space<vmem>>, vector<1x1xf32>
    %cst_15 = arith.constant dense<0xFF800000> : vector<1xf32>
    %17 = vector.multi_reduction <maximumf>, %15, %cst_15 [1] : vector<1x16xf32> to vector<1xf32>
    %18 = vector.shape_cast %17 : vector<1xf32> to vector<1x1xf32>
    %19 = arith.maximumf %16, %18 : vector<1x1xf32>
    %20 = arith.subf %16, %19 : vector<1x1xf32>
    %21 = math.exp %20 : vector<1x1xf32>
    %22 = vector.broadcast %19 : vector<1x1xf32> to vector<1x16xf32>
    %23 = arith.subf %15, %22 : vector<1x16xf32>
    %24 = math.exp %23 : vector<1x16xf32>
    %c0_16 = arith.constant 0 : index
    %c0_17 = arith.constant 0 : index
    %25 = vector.load %arg11[%c0_16, %c0_17] : memref<1x1xf32, #tpu.memory_space<vmem>>, vector<1x1xf32>
    %26 = arith.mulf %21, %25 : vector<1x1xf32>
    %cst_18 = arith.constant dense<0.000000e+00> : vector<1xf32>
    %27 = vector.multi_reduction <add>, %24, %cst_18 [1] : vector<1x16xf32> to vector<1xf32>
    %28 = vector.shape_cast %27 : vector<1xf32> to vector<1x1xf32>
    %29 = arith.addf %26, %28 : vector<1x1xf32>
    %c0_19 = arith.constant 0 : index
    %c0_20 = arith.constant 0 : index
    %30 = vector.load %arg11[%c0_19, %c0_20] : memref<1x1xf32, #tpu.memory_space<vmem>>, vector<1x1xf32>
    tpu.vector_store %arg11[%c0_19, %c0_20], %29 {strides = array<i32>} : memref<1x1xf32, #tpu.memory_space<vmem>>, vector<1x1xf32>,
    %cst_21 = arith.constant dense<0.000000e+00> : vector<1x32xf32>
    %31 = tpu.matmul %24, %9, %cst_21 {dimension_numbers = #tpu.dot_dimension_numbers<[1], [0], [0], [1], [0, 0, 1, 1], [], []>} : vector<1x16xf32>, vector<16x32xf32>, vector<1x32xf32> -> vector<1x32xf32>
    %c0_22 = arith.constant 0 : index
    %c0_23 = arith.constant 0 : index
    %32 = vector.load %arg12[%c0_22, %c0_23] : memref<1x32xf32, #tpu.memory_space<vmem>>, vector<1x32xf32>
    %33 = vector.broadcast %21 : vector<1x1xf32> to vector<1x32xf32>
    %34 = arith.mulf %33, %32 : vector<1x32xf32>
    %35 = arith.addf %34, %31 : vector<1x32xf32>
    %c0_24 = arith.constant 0 : index
    %c0_25 = arith.constant 0 : index
    %36 = vector.load %arg12[%c0_24, %c0_25] : memref<1x32xf32, #tpu.memory_space<vmem>>, vector<1x32xf32>
    tpu.vector_store %arg12[%c0_24, %c0_25], %35 {strides = array<i32>} : memref<1x32xf32, #tpu.memory_space<vmem>>, vector<1x32xf32>,
    %c0_26 = arith.constant 0 : index
    %c0_27 = arith.constant 0 : index
    %37 = vector.load %arg10[%c0_26, %c0_27] : memref<1x1xf32, #tpu.memory_space<vmem>>, vector<1x1xf32>
    tpu.vector_store %arg10[%c0_26, %c0_27], %19 {strides = array<i32>} : memref<1x1xf32, #tpu.memory_space<vmem>>, vector<1x1xf32>,
    %c0_i32_28 = arith.constant 0 : i32
    %38 = arith.cmpi eq, %arg1, %c0_i32_28 : i32
    %39 = arith.extui %38 : i1 to i32
    %c0_i32_29 = arith.constant 0 : i32
    %40 = arith.cmpi ne, %39, %c0_i32_29 : i32
    scf.if %40 {
      %c0_30 = arith.constant 0 : index
      %c0_31 = arith.constant 0 : index
      %41 = vector.load %arg12[%c0_30, %c0_31] : memref<1x32xf32, #tpu.memory_space<vmem>>, vector<1x32xf32>
      %c0_32 = arith.constant 0 : index
      %c0_33 = arith.constant 0 : index
      %42 = vector.load %arg11[%c0_32, %c0_33] : memref<1x1xf32, #tpu.memory_space<vmem>>, vector<1x1xf32>
      %43 = vector.broadcast %42 : vector<1x1xf32> to vector<1x32xf32>
      %44 = arith.divf %41, %43 : vector<1x32xf32>
      %c0_34 = arith.constant 0 : index
      %c0_35 = arith.constant 0 : index
      %45 = vector.load %arg7[%c0_34, %c0_35] : memref<32x4xf32, #tpu.memory_space<vmem>>, vector<32x4xf32>
      %cst_36 = arith.constant dense<0.000000e+00> : vector<1x4xf32>
      %46 = tpu.matmul %44, %45, %cst_36 {dimension_numbers = #tpu.dot_dimension_numbers<[1], [0], [0], [1], [0, 0, 1, 1], [], []>} : vector<1x32xf32>, vector<32x4xf32>, vector<1x4xf32> -> vector<1x4xf32>
      %c0_37 = arith.constant 0 : index
      %c0_38 = arith.constant 0 : index
      %47 = vector.load %arg8[%c0_37, %c0_38] : memref<1x4xf32, #tpu.memory_space<vmem>>, vector<1x4xf32>
      %48 = arith.addf %46, %47 : vector<1x4xf32>
      %c0_39 = arith.constant 0 : index
      %c0_40 = arith.constant 0 : index
      %c0_41 = arith.constant 0 : index
      %49 = vector.load %arg9[%c0_39, %c0_40, %c0_41] : memref<1x1x4xf32, #tpu.memory_space<vmem>>, vector<1x1x4xf32>
      %50 = vector.shape_cast %49 : vector<1x1x4xf32> to vector<1x4xf32>
      %51 = vector.shape_cast %48 : vector<1x4xf32> to vector<1x1x4xf32>
      tpu.vector_store %arg9[%c0_39, %c0_40, %c0_41], %51 {strides = array<i32>} : memref<1x1x4xf32, #tpu.memory_space<vmem>>, vector<1x1x4xf32>,
    } else {
    }
    return
  }
  func.func @transform_0(%arg0: i32, %arg1: i32) -> (i32, i32, i32) {
    %c0_i32 = arith.constant 0 : i32
    %c0_i32_0 = arith.constant 0 : i32
    return %arg0, %arg1, %c0_i32 : i32, i32, i32
  }
  func.func @transform_1(%arg0: i32, %arg1: i32) -> (i32, i32, i32) {
    %c0_i32 = arith.constant 0 : i32
    %c0_i32_0 = arith.constant 0 : i32
    return %arg0, %c0_i32, %arg1 : i32, i32, i32
  }
  func.func @transform_2(%arg0: i32, %arg1: i32) -> (i32, i32) {
    %c0_i32 = arith.constant 0 : i32
    %c0_i32_0 = arith.constant 0 : i32
    %c0_i32_1 = arith.constant 0 : i32
    return %c0_i32, %c0_i32_0 : i32, i32
  }
  func.func @transform_3(%arg0: i32, %arg1: i32) -> (i32, i32) {
    %c0_i32 = arith.constant 0 : i32
    %c0_i32_0 = arith.constant 0 : i32
    %c0_i32_1 = arith.constant 0 : i32
    return %c0_i32, %c0_i32_0 : i32, i32
  }
  func.func @transform_4(%arg0: i32, %arg1: i32) -> (i32, i32) {
    %c0_i32 = arith.constant 0 : i32
    %c0_i32_0 = arith.constant 0 : i32
    %c0_i32_1 = arith.constant 0 : i32
    return %c0_i32, %c0_i32_0 : i32, i32
  }
  func.func @transform_5(%arg0: i32, %arg1: i32) -> (i32, i32) {
    %c0_i32 = arith.constant 0 : i32
    %c0_i32_0 = arith.constant 0 : i32
    %c0_i32_1 = arith.constant 0 : i32
    return %c0_i32, %c0_i32_0 : i32, i32
  }
  func.func @transform_6(%arg0: i32, %arg1: i32) -> (i32, i32) {
    %c0_i32 = arith.constant 0 : i32
    %c0_i32_0 = arith.constant 0 : i32
    %c0_i32_1 = arith.constant 0 : i32
    return %c0_i32, %c0_i32_0 : i32, i32
  }
  func.func @transform_7(%arg0: i32, %arg1: i32) -> (i32, i32, i32) {
    %c0_i32 = arith.constant 0 : i32
    %c0_i32_0 = arith.constant 0 : i32
    %c0_i32_1 = arith.constant 0 : i32
    return %arg0, %c0_i32, %c0_i32_0 : i32, i32, i32
  }
}

</mosaic_0001>

<bundles_post_ra>
// kernel: tpu_custom_call.1
= control target key start
LH: loop header
LB: loop body
LE: loop exit
PB: predicated region body
PF: predicated region fallthrough
CT: control target
= control target key end

     0   :  { %12 = vsyncpa [#allocation6], 0  ;;  %s1347_s0 = inlined_call_operand.vmem [shape: f32[2,16,32], index: 0, kind: input, shape index: {}]   ;;  %s1348_s1 = inlined_call_operand.vmem [shape: f32[2,1,16], index: 1, kind: input, shape index: {}]   ;;  %s1349_s2 = inlined_call_operand.hbm [shape: f32[32,64], index: 2, kind: input, shape index: {}]   ;;  %s1350_s3 = inlined_call_operand.vmem [shape: f32[1,64], index: 3, kind: input, shape index: {}]   ;;  %s1351_s4 = inlined_call_operand.vmem [shape: f32[1,64], index: 4, kind: input, shape index: {}]   ;;  %s1352_s5 = inlined_call_operand.vmem [shape: f32[32,4], index: 5, kind: input, shape index: {}]   ;;  %s1353_s6 = inlined_call_operand.vmem [shape: f32[1,4], index: 6, kind: input, shape index: {}]   ;;  %s1354_s7 = inlined_call_operand.hbm [shape: f32[2,1,4], index: 7, kind: output, shape index: {}]  }
   0x1   :  { %13 = vsyncpa [#allocation7], 0 }
   0x2   :  { %15 = vsyncpa [#allocation7 + $0x1], 0  ;;  %s1166_s24 = smov 0   ;;  %s1168_s25 = smov 0  }
   0x3   :  { %s1170_s26 = smov 0   ;;  %s1172_s27 = smov 0  }
   0x4   :  { %s1174_s28 = smov 0   ;;  %s1176_s29 = smov 0  }
   0x5 LB: > { %s852_s30 = sadd.s32 4294967295, %s1116_s29   ;;  %s853_s8 = sadd.s32 4294967294, %s1116_s29   ;;  %s1116_s29 = sphi %s1176_s29, %s21_s29   ;;  %s1112_s28 = sphi %s1174_s28, %s1363_s28   ;;  %s1108_s27 = sphi %s1172_s27, %s1362_s27   ;;  %s1104_s26 = sphi %s1170_s26, %s1361_s26   ;;  %s1100_s25 = sphi %s1168_s25, %s1360_s25   ;;  %s1096_s24 = sphi %s1166_s24, %s1359_s24  }
   0x6   : > { %s33_s9 = sadd.s32 1, %s1112_s28  ;;  %s201_s10 = sadd.s32 1, %s1104_s26 }
   0x7   : > { %p35_p0 = scmp.ge.s32.totalorder %s33_s9, 2  ;;  %p211_p1 = scmp.ne.s32.totalorder %s1104_s26, %s1100_s25 }
   0x8   : > { %p212_p2 = scmp.eq.s32.totalorder %s852_s30, 1  ;;  %p217_p3 = scmp.ne.s32.totalorder %s1100_s25, %s1096_s24 }
   0x9   : > { %s1365_s9 = smov (%p35_p0, %s33_s9), 0  ;;  %p218_p5 = scmp.eq.s32.totalorder %s853_s8, 1 }
   0xa   : > { %p1206_p4 = por %p212_p2, %p211_p1  ;;  %s198_s12 = ssub.s32 %s1112_s28, %s1365_s9 }
   0xb   : > { %p854_p6 = scmp.ge.s32.totalorder %s1116_s29, 1  ;;  %p199_p7 = scmp.eq.s32.totalorder %s198_s12, 0 }
   0xc   : > { %p1213_p8 = por %p218_p5, %p217_p3  ;;  %p225_p9 = scmp.lt.s32.totalorder %s1116_s29, 3 }
   0xd   : > { %s1219_s14 = scalar_select %p199_p7, %s1104_s26, %s201_s10  }
   0xe   : > { %p1221_p10 = pnand %p854_p6, %p225_p9  ;;  %p1225_p11 = scmp.eq.s32.totalorder %s852_s30, 0 }
   0xf   : > { %s1118_s17 = smov [#allocation5]  }
  0x10   : > { %p932_p12 = pneg %p1221_p10  ;;  %s237_s18 = sshll.u32 %s1118_s17, 4  ;;  %s238_s18 = int_to_ptr.vmem [resolvable:$true] %s237_s18 }
  0x11   : > { %s1021_s19 = scalar_lea.vmem %s238_s18, 512  ;;  %p1029_p5 = scmp.lt.s32.totalorder %s238_s18, %s238_s18 }
  0x12   : > { %p933_p13 = pnand %p1225_p11, %p932_p12  ;;  %p1022_p1 = scmp.ne.s32.totalorder %s238_s18, %s1021_s19 }
  0x13   : > { %p1030_p6 = scmp.lt.s32.totalorder %s1021_s19, %s1021_s19 }
  0x14   : > { %p1012_p0 = pneg %p933_p13 }
  0x15   : > { %p1031_p7 = por %p1030_p6, %p1029_p5 }
  0x16   : > { %p1024_p2 = pnand %p1022_p1, %p1012_p0 }
  0x18   : > { %p1025_p3 = pneg %p1024_p2 }
  0x1a   : > { %p1032_p9 = pnand %p1031_p7, %p1025_p3 }
  0x1c   : > { %1035 = shalt.err (!%p1032_p9)
}
  0x1d   : > { %s1119_s20 = smov 128   ;;  %s1120_s21 = smov 8  }
  0x1e   : > { %935 = dma.hbm_to_vmem [thread:$0]  (!%p933_p13), %s1349_s2, 512, %s238_s18, [#allocation6], %s1119_s20, %s1119_s20, %s1120_s21  }
  0x1f   : > { %287 = sbr.rel (%p1221_p10) target bundleno = 1243 (0x4db), region = 48 }
  0x24   : > { %1087 = dma.done.wait (%p1225_p11), [#allocation6], 512  }
  0x25   : > { %1089 = vsyncadd (%p1225_p11), [#allocation6], 4294966784  ;;  %p329_p12 = scmp.lt.s32.totalorder %s1108_s27, 1  ;;  %vm368_vm0 = vcmask 261120   ;;  %v356_v0 = vld [vmem:[#allocation5 + $0x18] sm:$0xff]  ;;  %v355_v1 = vld [vmem:[#allocation5 + $0x10] sm:$0xff]  ;;  %v546_v26 = vlaneseq }
  0x26   : > { %890 = vmatprep.subr.mxu0 %v356_v0  ;;  %v354_v3 = vld [vmem:[#allocation5 + $0x8] sm:$0xff]  ;;  %v353_v4 = vld [vmem:[#allocation5] sm:$0xff]  ;;  %v1121_v6 = vmov 0.0   ;;  %vm1122_vm1 = vmmov 0   ;;  %v861_v7 = vld [vmem:[%s1350_s3] ss:$0 sm:$0xff] }
  0x27   : > { %s1244_s30 = scalar_select %p329_p12, %s1108_s27, 1  ;;  %891 = vmatpush3.msra.mxu0 %v356_v0  ;;  %901 = vmatprep.subr.mxu1 %v1121_v6  ;;  %vm452_vm2 = vcmask 523264   ;;  %v358_v14 = vld [vmem:[%s1351_s4] sm:$0x1]  ;;  %vm348_vm3 = vcmask 0   ;;  %v1123_v15 = vmov -inf  }
  0x28   : > { %892 = vmatprep.subr.mxu0 %v355_v1  ;;  %905 = vmatprep.mubr.msk.f32.mxu1 %vm1122_vm1, %v1121_v6  ;;  %349 = vst.msk [vmem:[#allocation2] sm:$0x1] %vm348_vm3, %v1123_v15  ;;  %350 = vst.msk [vmem:[#allocation3] sm:$0x1] %vm348_vm3, %v1121_v6  ;;  %vm533_vm4 = vcmask 122880   ;;  %v1124_v21 = vmov 0  }
  0x29   : > { %s872_s8 = sshll.u32 %s1244_s30, 4  ;;  %893 = vmatpush3.msra.mxu0 %v355_v1  ;;  %s343_s22 = scalar_lea.vmem %s1348_s1, %s1244_s30  ;;  %998 = vset.pattern.permute.xlu0 %v1124_v21  ;;  %v547_v27 = vshrl.u32 %v546_v26, 7  ;;  %vm561_vm5 = vcmask 130048   ;;  %vm351_vm6 = vcmask 253952   ;;  %v669_v42 = vld [vmem:[%s1352_s5 + $0x18] sm:$0xff]  ;;  %v668_v43 = vld [vmem:[%s1352_s5 + $0x10] sm:$0xff] }
  0x2a   : > { %s336_s17 = scalar_lea.vmem %s1347_s0, %s872_s8  ;;  %894 = vmatprep.subr.mxu0 %v354_v3  ;;  %v359_v16 = vld [vmem:[%s343_s22] sm:$0x1]  ;;  %999 = vset.pattern.permute.xlu1 %v1124_v21  ;;  %352 = vst.msk [vmem:[#allocation4] sm:$0x1] %vm351_vm6, %v1121_v6  ;;  %v667_v44 = vld [vmem:[%s1352_s5 + $0x8] sm:$0xff]  ;;  %s326_s18 = sand.u32 1, %s1100_s25  }
  0x2b   : > { %v360_v2 = vld [vmem:[%s336_s17] sm:$0xff]  ;;  %895 = vmatpush3.msra.mxu0 %v354_v3  ;;  %v361_v5 = vld [vmem:[%s336_s17 + $0x8] sm:$0xff]  ;;  %v548_v28 = vsub.s32 0, %v547_v27  ;;  %s869_s21 = sshll.u32 %s1108_s27, 4  ;;  %s327_s22 = scalar_lea.vmem [#allocation8], %s326_s18  ;;  %vm744_vm7 = vcmask 24576  }
  0x2c   : > { %898 = vmatprep.mubr.msk.f32.mxu0 %vm368_vm0, %v360_v2  ;;  %896 = vmatprep.subr.mxu0 %v353_v4  ;;  %v666_v45 = vld [vmem:[%s1352_s5] sm:$0xff]  ;;  %s759_s23 = sshll.u32 %s327_s22, 4  ;;  %s1307_s10 = scalar_lea.hbm %s1354_s7, %s869_s21  ;;  %s760_s23 = int_to_ptr.vmem [resolvable:$true] %s759_s23 }
  0x2d   : > { %897 = vmatpush3.msra.mxu0 %v353_v4  ;;  %v670_v58 = vld [vmem:[%s1353_s6] sm:$0x1]  ;;  %s747_s12 = scalar_lea.sflag [#allocation7], %s326_s18  ;;  %s1036_s17 = scalar_lea.vmem %s760_s23, 16 }
  0x2e   : > { %899 = vmatmul.mubr.msk.f32.vlgmr.msra.gmra.mxu0 %vm368_vm0, %v361_v5  ;;  %908 = vmatprep.subr.mxu0 %v1121_v6  ;;  %p1037_p10 = scmp.ne.s32.totalorder %s760_s23, %s1036_s17  ;;  %s1125_s27 = smov [#allocation8]  }
  0x2f   : > { %909 = vmatpush3.msra.mxu0 %v361_v5  ;;  %912 = vmatprep.mubr.msk.f32.mxu0 %vm1122_vm1, %v1121_v6  ;;  %v532_v22 = vld [vmem:[#allocation2] sm:$0x1]  ;;  %v553_v37 = vld [vmem:[#allocation3] sm:$0x1]  ;;  %s1040_s15 = sshll.u32 %s1125_s27, 4  ;;  %s1041_s15 = int_to_ptr.vmem [resolvable:$false] %s1040_s15 }
  0x30   : > { %910 = vmatprep.subr.mxu0 %v1121_v6  ;;  %p1038_p11 = pnand %p1037_p10, %p1206_p4  ;;  %s1042_s16 = scalar_lea.vmem %s1041_s15, 32 }
  0x31   : > { %911 = vmatpush3.msra.mxu0 %v360_v2  ;;  %v635_v50 = vld [vmem:[#allocation4] sm:$0x1]  ;;  %p1043_p0 = scmp.lt.s32.totalorder %s760_s23, %s1041_s15  ;;  %p1044_p1 = scmp.lt.s32.totalorder %s1042_s16, %s1036_s17 }
  0x32   : > { %p1039_p13 = pneg %p1038_p11 }
  0x33   : > { %p1045_p2 = por %p1044_p1, %p1043_p0 }
  0x35   : > { %p1046_p3 = pnand %p1045_p2, %p1039_p13 }
  0xee   : > { %v900_v8 = vpop.f32.mrf.mxu0 }
  0xef   : > { %v447_v9 = vadd.f32 %v900_v8, %v861_v7 }
  0xf0   : > { %v441_v10 = vpop.f32.mrf.mxu0 }
  0xf1   : > { %1000 = vtanh.f32 %v447_v9  ;;  %v442_v11 = vadd.f32 %v861_v7, %v441_v10 }
  0xf3   : > { %1002 = vtanh.f32 %v442_v11 }
  0xfe   : > { %v1001_v12 = vpop.eup %1000 }
  0xff   : > { %902 = vmatpush3.xpose.msk.msra.mxu1 %vm452_vm2, %v1001_v12 }
 0x100   : > { %903 = vmatprep.subr.mxu1 %v1121_v6  ;;  %v1003_v13 = vpop.eup %1002 }
 0x103   : > { %904 = vmatpush3.xpose.msk.msra.mxu1 %vm452_vm2, %v1003_v13 }
 0x104   : > { %915 = vmatprep.subr.mxu1 %v1121_v6 }
 0x106   : > { %906 = vmatmul.mubr.msk.f32.vlgmr.msra.gmra.mxu1 %vm452_vm2, %v358_v14 }
 0x107   : > { %923 = vmatprep.mubr.msk.f32.mxu1 %vm1122_vm1, %v1121_v6  ;;  %916 = vmatpush3.msra.mxu1 %v669_v42 }
 0x108   : > { %917 = vmatprep.subr.mxu1 %v1121_v6 }
 0x109   : > { %918 = vmatpush3.msra.mxu1 %v668_v43 }
 0x10a   : > { %919 = vmatprep.subr.mxu1 %v1121_v6 }
 0x10b   : > { %920 = vmatpush3.msra.mxu1 %v667_v44 }
 0x10c   : > { %921 = vmatprep.subr.mxu1 %v1121_v6 }
 0x10d   : > { %922 = vmatpush3.msra.mxu1 %v666_v45 }
 0x1c6   : > { %v528_v17 = vpop.f32.mrf.mxu1 }
 0x1c7   : > { %v529_v18 = vadd.f32 %v528_v17, %v359_v16 }
 0x1c8   : > { %v907_v19 = vpop.f32.mrf.mxu1 }
 0x1c9   : > { %v534_v20 = vsel %vm533_vm4, %v529_v18, -inf }
 0x1ca   : > { %535 = vmax.xlane.f32.xlu0 %v534_v20 }
 0x253   : > { %v536_v23 = vpop.xlane.xlu0 %535 }
 0x254   : > { %v537_v24 = vmax.f32 %v532_v22, %v536_v23 }
 0x256   : > { %v538_v25 = vsub.f32 %v532_v22, %v537_v24  ;;  %649 = vst.msk [vmem:[#allocation2] sm:$0x1] %vm348_vm3, %v537_v24  ;;  %543 = vperm.xlu0 %998, %v537_v24  }
 0x258   : > { %v539_v35 = vmul.f32 1.442695, %v538_v25 }
 0x2d1   : > { %v544_v29 = vpop.permute.xlu0 %543 }
 0x2d2   : > { %v549_v30 = vrot.slane %v544_v29, %v548_v28 }
 0x2d4   : > { %v550_v31 = vsub.f32 %v529_v18, %v549_v30 }
 0x2d6   : > { %v551_v32 = vmul.f32 1.442695, %v550_v31 }
 0x2d8   : > { %1004 = vpow2.f32 %v551_v32 }
 0x2d9   : > { %1006 = vpow2.f32 %v539_v35 }
 0x2e5   : > { %v1005_v33 = vpop.eup %1004 }
 0x2e6   : > { %913 = vmatmul.mubr.msk.f32.vlgmr.msra.gmra.mxu0 %vm561_vm5, %v1005_v33  ;;  %v555_v34 = vsel %vm533_vm4, %v1005_v33, 0.0  ;;  %v1007_v36 = vpop.eup %1006 }
 0x2e7   : > { %556 = vadd.xlane.f32.xlu1 %v555_v34  ;;  %v554_v38 = vmul.f32 %v1007_v36, %v553_v37 }
 0x370   : > { %v557_v39 = vpop.xlane.xlu1 %556 }
 0x371   : > { %v558_v40 = vadd.f32 %v557_v39, %v554_v38 }
 0x373   : > { %560 = vst.msk [vmem:[#allocation3] sm:$0x1] %vm348_vm3, %v558_v40 }
 0x37a   : > { %v654_v41 = vld [vmem:[#allocation3] sm:$0x1] }
 0x37b   : > { %657 = vperm.xlu1 %999, %v654_v41  }
 0x37f   : > { %638 = vperm.xlu1 %999, %v1007_v36  }
 0x3a6   : > { %v631_v46 = vpop.f32.mrf.mxu0 }
 0x3a8   : > { %v914_v47 = vpop.f32.mrf.mxu0 }
 0x3f6   : > { %v658_v48 = vpop.permute.xlu1 %657 }
 0x3f7   : > { %v663_v49 = vrot.slane %v658_v48, %v548_v28 }
 0x3f9   : > { %1008 = vrcp.f32 %v663_v49 }
 0x3fa   : > { %v639_v51 = vpop.permute.xlu1 %638 }
 0x3fb   : > { %v644_v52 = vrot.slane %v639_v51, %v548_v28 }
 0x3fd   : > { %v645_v53 = vmul.f32 %v644_v52, %v635_v50 }
 0x3ff   : > { %v646_v54 = vadd.f32 %v645_v53, %v631_v46 }
 0x401   : > { %648 = vst.msk [vmem:[#allocation4] sm:$0x1] %vm351_vm6, %v646_v54 }
 0x406   : > { %v1009_v55 = vpop.eup %1008 }
 0x408   : > { %v653_v56 = vld [vmem:[#allocation4] sm:$0x1] }
 0x409   : > { %v665_v57 = vmul.f32 %v1009_v55, %v653_v56 }
 0x40b   : > { %924 = vmatmul.mubr.msk.f32.vlgmr.msra.gmra.mxu1 %vm368_vm0, %v665_v57 }
 0x4cb   : > { %v740_v59 = vpop.f32.mrf.mxu1 }
 0x4cc   : > { %v741_v60 = vadd.f32 %v740_v59, %v670_v58 }
 0x4cd   : > { %v925_v61 = vpop.f32.mrf.mxu1 }
 0x4ce   : > { %745 = vst.msk [vmem:[%s327_s22] sm:$0x1] %vm744_vm7, %v741_v60 }
 0x4cf   : > { %1049 = shalt.err (!%p1046_p3)
}
 0x4d0   : > { %s1050_s19 = scalar_lea.hbm %s1307_s10, 16  ;;  %s1054_s21 = scalar_lea.hbm %s1354_s7, 32 }
 0x4d1   : > { %p1051_p5 = scmp.ne.s32.totalorder %s1307_s10, %s1050_s19  ;;  %p1055_p9 = scmp.lt.s32.totalorder %s1307_s10, %s1354_s7 }
 0x4d2   : > { %p1056_p12 = scmp.lt.s32.totalorder %s1054_s21, %s1050_s19 }
 0x4d3   : > { %p1052_p6 = pnand %p1051_p5, %p1206_p4 }
 0x4d4   : > { %p1057_p10 = por %p1056_p12, %p1055_p9 }
 0x4d5   : > { %p1053_p7 = pneg %p1052_p6 }
 0x4d7   : > { %p1058_p11 = pnand %p1057_p10, %p1053_p7 }
 0x4d9   : > { %1061 = shalt.err (!%p1058_p11)
}
 0x4da   : > { %930 = dma.vmem_to_hbm [thread:$0]  (%p1206_p4), %s760_s23, 16, %s1307_s10, %s747_s12  }
 0x4db PF: > { %p942_p13 = scmp.ge.s32.totalorder %s1116_s29, 2  ;;  %s771_s8 = sand.u32 1, %s1096_s24  }
 0x4dc   : > { %s772_s17 = scalar_lea.sflag [#allocation7], %s771_s8 }
 0x4dd   : > { %p937_p0 = pnand %p942_p13, %p1213_p8 }
 0x4df   : > { %p938_p1 = pneg %p937_p0 }
 0x4e1   : > { %1091 = dma.done.wait (%p938_p1), %s772_s17, 16  }
 0x4e2   : > { %1093 = vsyncadd (%p938_p1), %s772_s17, 4294967280  ;;  %s21_s29 = sadd.s32 1, %s1116_s29   ;;  %s1359_s24 = smov %s1100_s25 }
 0x4e3   : > { %p18_p2 = scmp.ge.s32.totalorder %s21_s29, 4   ;;  %s1360_s25 = smov %s1104_s26 }
 0x4e4   : > { %s1361_s26 = smov %s1219_s14  ;;  %s1362_s27 = smov %s1112_s28 }
 0x4e5   : > { %s1363_s28 = smov %s1365_s9  ;;  %20 = sbr.rel (!%p18_p2) target bundleno = 5 (0x5), region = 99 }
 0x4ea   :  { %776 = vsyncpa [#allocation6], 1 }
 0x4eb   :  { %778 = vsyncpa [#allocation6 + $0x1], 1 }
 0x4ec   :  { %779 = vsyncpa [#allocation7], 1 }
 0x4ed   :  { %781 = vsyncpa [#allocation7 + $0x1], 1 }

</bundles_post_ra>
